<compile_context>
chip_gen: v7x
topology: tpu7x:2x2x1
jax: 0.10.0
libtpu: 0.0.40
codegen_flags: <defaults>
</compile_context>

<pallas_src>
import functools

import jax
import jax.numpy as jnp
from jax.experimental import pallas as pl
from jax.experimental.pallas import tpu as pltpu


def _round_up(n, m):
    return ((n + m - 1) // m) * m


def _stochastic_mlp_kernel(x_ref, eps_ref, *refs):
    """Fused trunk (Linear+relu)xN, fused mu|logvar head, reparameterized sample.

    refs = (w0, b0, w1, b1, ..., w_head, b_head, out_ref).
    """
    *wb_refs, o_ref = refs
    n_layers = len(wb_refs) // 2          # trunk layers + 1 fused head
    latent = eps_ref.shape[-1]

    # bf16 MXU operands, f32 accumulate; bias-add / relu / exp / reparam in f32.
    h = x_ref[...].astype(jnp.bfloat16)   # cast happens in VMEM, not in HBM
    for i in range(n_layers - 1):         # trunk: Linear + relu
        w_ref, b_ref = wb_refs[2 * i], wb_refs[2 * i + 1]
        a = jnp.dot(h, w_ref[...], preferred_element_type=jnp.float32) + b_ref[...]
        h = jnp.maximum(a, 0.0).astype(jnp.bfloat16)

    # Fused heads: one dot of width 2*latent instead of two half-width dots.
    wh_ref, bh_ref = wb_refs[-2], wb_refs[-1]
    head = jnp.dot(h, wh_ref[...], preferred_element_type=jnp.float32) + bh_ref[...]
    mu = head[:, :latent]
    logvar = head[:, latent:]

    # Reparameterization: eps * exp(0.5 * logvar) + mu  (exp goes to the EUP).
    o_ref[...] = (eps_ref[...] * jnp.exp(0.5 * logvar) + mu).astype(o_ref.dtype)

    # TODO(synk): dropout (drp>0), BatchNorm1d/LayerNorm/InstanceNorm branches
    # and the vae=True / get_values=True (return (mu, logvar)) path are
    # disabled in the default config and are not implemented here.


def init_raw_params(key, input_dim, latent_dim, hidden):
    """f32 params matching the PyTorch module layout: trunk layers, then a
    mu head and a logvar head.  Weights stored as (in, out) = W^T.
    xavier_uniform weights / zero bias (change_init=True; the extra logvar
    head's PyTorch-default init is an init-only detail)."""
    dims = [input_dim] + list(hidden)
    specs = [(dims[i], dims[i + 1]) for i in range(len(dims) - 1)]
    specs += [(hidden[-1], latent_dim), (hidden[-1], latent_dim)]   # mu, logvar
    params = []
    for fan_in, fan_out in specs:
        key, sub = jax.random.split(key)
        bound = jnp.sqrt(6.0 / (fan_in + fan_out))
        w = jax.random.uniform(sub, (fan_in, fan_out), jnp.float32, -bound, bound)
        b = jnp.zeros((fan_out,), jnp.float32)
        params.append((w, b))
    return params


def prepare_params(raw_params):
    """One-time (outside jit) packing: weights cast to bf16 at their natural
    shapes (no lane padding; Mosaic tiles internally), biases kept f32 as
    (1, out), and the mu / logvar heads fused into a single weight + bias so
    the kernel runs one head matmul instead of two."""
    *trunk, (wmu, bmu), (wlv, blv) = raw_params
    packed = []
    for w, b in trunk:
        packed.append((w.astype(jnp.bfloat16),
                       b.reshape(1, -1).astype(jnp.float32)))
    wh = jnp.concatenate([wmu, wlv], axis=1).astype(jnp.bfloat16)
    bh = jnp.concatenate([bmu, blv]).reshape(1, -1).astype(jnp.float32)
    packed.append((wh, bh))
    return tuple(packed)


def _pick_batch_tile(batch, tile_b):
    """Pick a batch tile (multiple of 8) that (a) gives >= 2 grid steps when
    possible so both v7x TensorCores get work on the 'parallel' axis and
    (b) keeps zero-padded tail rows under ~10% of the batch."""
    if batch <= 8:
        return batch                       # one full-batch tile
    tile_b = max(8, _round_up(tile_b, 8))
    tb = min(tile_b, _round_up(batch, 8))
    tb = min(tb, _round_up(pl.cdiv(batch, 2), 8))      # at least two tiles
    while tb > 8 and (tb * pl.cdiv(batch, tb) - batch) * 10 > batch:
        tb -= 8                                        # shrink padded tail
    return tb


@functools.partial(jax.jit, static_argnames=("tile_b",))
def stochastic_mlp_forward(x, eps, params, *, tile_b=1024):
    """x: (batch, input_dim) f32, eps: (batch, latent_dim) f32 standard normal.
    params: output of prepare_params()."""
    batch, d_in = x.shape
    latent = eps.shape[1]
    tb = _pick_batch_tile(batch, tile_b)
    nb = pl.cdiv(batch, tb)                 # ragged tail handled by Pallas masking

    flat_wb = []
    in_specs = [pl.BlockSpec((tb, d_in), lambda i: (i, 0)),      # x (full feature dim)
                pl.BlockSpec((tb, latent), lambda i: (i, 0))]    # eps (natural width)
    for w, b in params:
        # Constant index_maps: weights/biases are DMA'd once and stay resident.
        in_specs.append(pl.BlockSpec(w.shape, lambda i: (0, 0)))
        in_specs.append(pl.BlockSpec(b.shape, lambda i: (0, 0)))
        flat_wb += [w, b]
    out_spec = pl.BlockSpec((tb, latent), lambda i: (i, 0))

    # Cost estimate (advisory, helps XLA scheduling around the custom call).
    dims = [d_in] + [w.shape[1] for w, _ in params]
    flops = 2 * batch * sum(dims[i] * dims[i + 1] for i in range(len(dims) - 1))
    weight_bytes = sum(int(w.size) * w.dtype.itemsize + int(b.size) * b.dtype.itemsize
                       for w, b in params)
    bytes_accessed = int(x.size) * 4 + int(eps.size) * 4 + batch * latent * 4 + weight_bytes
    cost = pl.CostEstimate(flops=flops, transcendentals=batch * latent,
                           bytes_accessed=bytes_accessed)

    # VMEM budget: x/eps/out tiles are double-buffered; resident weights get 2
    # buffers reserved; plus live f32 intermediates.  Only raise the scoped
    # limit when needed, staying under v7x's 64 MiB/TC.
    widest = max([d_in, latent] + [w.shape[1] for w, _ in params])
    vmem_est = (2 * tb * (d_in + 2 * latent) * 4
                + 2 * weight_bytes
                + 4 * tb * widest * 4)
    vmem_limit = None
    if vmem_est > 16 * 2**20:
        vmem_limit = int(min(vmem_est * 3 // 2, 60 * 2**20))
    # TODO(synk): if resident weights alone approach ~50 MiB (very large hidden
    # dims), switch to a K-tiled "arbitrary" grid axis streaming weight slabs
    # into a VMEM f32 accumulator instead of keeping all weights resident.

    return pl.pallas_call(
        _stochastic_mlp_kernel,
        out_shape=jax.ShapeDtypeStruct((batch, latent), jnp.float32),
        grid_spec=pltpu.PrefetchScalarGridSpec(
            num_scalar_prefetch=0,
            grid=(nb,),
            in_specs=in_specs,
            out_specs=out_spec,
        ),
        compiler_params=pltpu.CompilerParams(
            dimension_semantics=("parallel",),
            vmem_limit_bytes=vmem_limit),
        cost_estimate=cost,
    )(x, eps, *flat_wb)


def stochastic_mlp_reference(x, eps, raw_params):
    """Plain-JAX reference mirroring the kernel's bf16-MXU / f32-accumulate math."""
    *trunk, (wmu, bmu), (wlv, blv) = raw_params

    def lin(h, w, b):
        return jnp.dot(h.astype(jnp.bfloat16), w.astype(jnp.bfloat16),
                       preferred_element_type=jnp.float32) + b

    h = x
    for w, b in trunk:
        h = jnp.maximum(lin(h, w, b), 0.0)
    mu = lin(h, wmu, bmu)
    logvar = lin(h, wlv, blv)
    return eps * jnp.exp(0.5 * logvar) + mu


if __name__ == "__main__":
    # Small shapes consistent with the module: StochasticMLP(input_dim=16,
    # latent_dim=8, layers=[32, 32, 32]) applied to x of shape (16, 16).
    input_dim, latent_dim, hidden = 16, 8, [32, 32, 32]
    batch = 16

    key = jax.random.PRNGKey(0)
    kx, ke, kp = jax.random.split(key, 3)
    x = jax.random.normal(kx, (batch, input_dim), jnp.float32)
    # torch.randn_like(std) is supplied explicitly so the kernel is deterministic.
    eps = jax.random.normal(ke, (batch, latent_dim), jnp.float32)

    raw_params = init_raw_params(kp, input_dim, latent_dim, hidden)
    params = prepare_params(raw_params)

    out = stochastic_mlp_forward(x, eps, params, tile_b=1024)
    out = jax.block_until_ready(out)

    ref = stochastic_mlp_reference(x, eps, raw_params)
    assert out.shape == (batch, latent_dim)
    max_err = float(jnp.max(jnp.abs(out - ref)))
    assert jnp.allclose(out, ref, atol=2e-3, rtol=2e-3), max_err

    print("KERNEL_OK")
</pallas_src>

<mosaic_0001>
module attributes {stable_mosaic.version = 11 : i64} {
  func.func @_stochastic_mlp_kernel(%arg0: i32, %arg1: memref<8x16xf32, #tpu.memory_space<vmem>>, %arg2: memref<8x8xf32, #tpu.memory_space<vmem>>, %arg3: memref<16x32xbf16, #tpu.memory_space<vmem>>, %arg4: memref<1x32xf32, #tpu.memory_space<vmem>>, %arg5: memref<32x32xbf16, #tpu.memory_space<vmem>>, %arg6: memref<1x32xf32, #tpu.memory_space<vmem>>, %arg7: memref<32x32xbf16, #tpu.memory_space<vmem>>, %arg8: memref<1x32xf32, #tpu.memory_space<vmem>>, %arg9: memref<32x16xbf16, #tpu.memory_space<vmem>>, %arg10: memref<1x16xf32, #tpu.memory_space<vmem>>, %arg11: memref<8x8xf32, #tpu.memory_space<vmem>>) attributes {dimension_semantics = [#tpu.dimension_semantics<parallel>], iteration_bounds = array<i64: 2>, scalar_prefetch = 0 : i64, scratch_operands = 0 : i64, tpu.core_type = #tpu.core_type<tc>, window_params = [{transform_indices = @transform_0, window_bounds = array<i64: 8, 16>}, {transform_indices = @transform_1, window_bounds = array<i64: 8, 8>}, {pipeline_mode = #tpu.pipeline_mode<synchronous>, transform_indices = @transform_2, window_bounds = array<i64: 16, 32>}, {pipeline_mode = #tpu.pipeline_mode<synchronous>, transform_indices = @transform_3, window_bounds = array<i64: 1, 32>}, {pipeline_mode = #tpu.pipeline_mode<synchronous>, transform_indices = @transform_4, window_bounds = array<i64: 32, 32>}, {pipeline_mode = #tpu.pipeline_mode<synchronous>, transform_indices = @transform_5, window_bounds = array<i64: 1, 32>}, {pipeline_mode = #tpu.pipeline_mode<synchronous>, transform_indices = @transform_6, window_bounds = array<i64: 32, 32>}, {pipeline_mode = #tpu.pipeline_mode<synchronous>, transform_indices = @transform_7, window_bounds = array<i64: 1, 32>}, {pipeline_mode = #tpu.pipeline_mode<synchronous>, transform_indices = @transform_8, window_bounds = array<i64: 32, 16>}, {pipeline_mode = #tpu.pipeline_mode<synchronous>, transform_indices = @transform_9, window_bounds = array<i64: 1, 16>}, {transform_indices = @transform_10, window_bounds = array<i64: 8, 8>}]} {
    %c0 = arith.constant 0 : index
    %c0_0 = arith.constant 0 : index
    %0 = vector.load %arg1[%c0, %c0_0] : memref<8x16xf32, #tpu.memory_space<vmem>>, vector<8x16xf32>
    %1 = arith.truncf %0 : vector<8x16xf32> to vector<8x16xbf16>
    %c0_1 = arith.constant 0 : index
    %c0_2 = arith.constant 0 : index
    %2 = vector.load %arg3[%c0_1, %c0_2] : memref<16x32xbf16, #tpu.memory_space<vmem>>, vector<16x32xbf16>
    %cst = arith.constant dense<0.000000e+00> : vector<8x32xf32>
    %3 = tpu.matmul %1, %2, %cst {dimension_numbers = #tpu.dot_dimension_numbers<[1], [0], [0], [1], [0, 0, 1, 1], [], []>} : vector<8x16xbf16>, vector<16x32xbf16>, vector<8x32xf32> -> vector<8x32xf32>
    %c0_3 = arith.constant 0 : index
    %c0_4 = arith.constant 0 : index
    %4 = vector.load %arg4[%c0_3, %c0_4] : memref<1x32xf32, #tpu.memory_space<vmem>>, vector<1x32xf32>
    %5 = vector.broadcast %4 : vector<1x32xf32> to vector<8x32xf32>
    %6 = arith.addf %3, %5 : vector<8x32xf32>
    %cst_5 = arith.constant 0.000000e+00 : f32
    %7 = vector.broadcast %cst_5 : f32 to vector<8x32xf32>
    %8 = arith.maximumf %6, %7 : vector<8x32xf32>
    %9 = arith.truncf %8 : vector<8x32xf32> to vector<8x32xbf16>
    %c0_6 = arith.constant 0 : index
    %c0_7 = arith.constant 0 : index
    %10 = vector.load %arg5[%c0_6, %c0_7] : memref<32x32xbf16, #tpu.memory_space<vmem>>, vector<32x32xbf16>
    %cst_8 = arith.constant dense<0.000000e+00> : vector<8x32xf32>
    %11 = tpu.matmul %9, %10, %cst_8 {dimension_numbers = #tpu.dot_dimension_numbers<[1], [0], [0], [1], [0, 0, 1, 1], [], []>} : vector<8x32xbf16>, vector<32x32xbf16>, vector<8x32xf32> -> vector<8x32xf32>
    %c0_9 = arith.constant 0 : index
    %c0_10 = arith.constant 0 : index
    %12 = vector.load %arg6[%c0_9, %c0_10] : memref<1x32xf32, #tpu.memory_space<vmem>>, vector<1x32xf32>
    %13 = vector.broadcast %12 : vector<1x32xf32> to vector<8x32xf32>
    %14 = arith.addf %11, %13 : vector<8x32xf32>
    %cst_11 = arith.constant 0.000000e+00 : f32
    %15 = vector.broadcast %cst_11 : f32 to vector<8x32xf32>
    %16 = arith.maximumf %14, %15 : vector<8x32xf32>
    %17 = arith.truncf %16 : vector<8x32xf32> to vector<8x32xbf16>
    %c0_12 = arith.constant 0 : index
    %c0_13 = arith.constant 0 : index
    %18 = vector.load %arg7[%c0_12, %c0_13] : memref<32x32xbf16, #tpu.memory_space<vmem>>, vector<32x32xbf16>
    %cst_14 = arith.constant dense<0.000000e+00> : vector<8x32xf32>
    %19 = tpu.matmul %17, %18, %cst_14 {dimension_numbers = #tpu.dot_dimension_numbers<[1], [0], [0], [1], [0, 0, 1, 1], [], []>} : vector<8x32xbf16>, vector<32x32xbf16>, vector<8x32xf32> -> vector<8x32xf32>
    %c0_15 = arith.constant 0 : index
    %c0_16 = arith.constant 0 : index
    %20 = vector.load %arg8[%c0_15, %c0_16] : memref<1x32xf32, #tpu.memory_space<vmem>>, vector<1x32xf32>
    %21 = vector.broadcast %20 : vector<1x32xf32> to vector<8x32xf32>
    %22 = arith.addf %19, %21 : vector<8x32xf32>
    %cst_17 = arith.constant 0.000000e+00 : f32
    %23 = vector.broadcast %cst_17 : f32 to vector<8x32xf32>
    %24 = arith.maximumf %22, %23 : vector<8x32xf32>
    %25 = arith.truncf %24 : vector<8x32xf32> to vector<8x32xbf16>
    %c0_18 = arith.constant 0 : index
    %c0_19 = arith.constant 0 : index
    %26 = vector.load %arg9[%c0_18, %c0_19] : memref<32x16xbf16, #tpu.memory_space<vmem>>, vector<32x16xbf16>
    %cst_20 = arith.constant dense<0.000000e+00> : vector<8x16xf32>
    %27 = tpu.matmul %25, %26, %cst_20 {dimension_numbers = #tpu.dot_dimension_numbers<[1], [0], [0], [1], [0, 0, 1, 1], [], []>} : vector<8x32xbf16>, vector<32x16xbf16>, vector<8x16xf32> -> vector<8x16xf32>
    %c0_21 = arith.constant 0 : index
    %c0_22 = arith.constant 0 : index
    %28 = vector.load %arg10[%c0_21, %c0_22] : memref<1x16xf32, #tpu.memory_space<vmem>>, vector<1x16xf32>
    %29 = vector.broadcast %28 : vector<1x16xf32> to vector<8x16xf32>
    %30 = arith.addf %27, %29 : vector<8x16xf32>
    %31 = vector.extract_strided_slice %30 {offsets = [0, 0], sizes = [8, 8], strides = [1, 1]} : vector<8x16xf32> to vector<8x8xf32>
    %32 = vector.extract_strided_slice %30 {offsets = [0, 8], sizes = [8, 8], strides = [1, 1]} : vector<8x16xf32> to vector<8x8xf32>
    %c0_23 = arith.constant 0 : index
    %c0_24 = arith.constant 0 : index
    %33 = vector.load %arg2[%c0_23, %c0_24] : memref<8x8xf32, #tpu.memory_space<vmem>>, vector<8x8xf32>
    %cst_25 = arith.constant 5.000000e-01 : f32
    %34 = vector.broadcast %cst_25 : f32 to vector<8x8xf32>
    %35 = arith.mulf %34, %32 : vector<8x8xf32>
    %36 = math.exp %35 : vector<8x8xf32>
    %37 = arith.mulf %33, %36 : vector<8x8xf32>
    %38 = arith.addf %37, %31 : vector<8x8xf32>
    %c0_26 = arith.constant 0 : index
    %c0_27 = arith.constant 0 : index
    %39 = vector.load %arg11[%c0_26, %c0_27] : memref<8x8xf32, #tpu.memory_space<vmem>>, vector<8x8xf32>
    tpu.vector_store %arg11[%c0_26, %c0_27], %38 {strides = array<i32>} : memref<8x8xf32, #tpu.memory_space<vmem>>, vector<8x8xf32>,
    return
  }
  func.func @transform_0(%arg0: i32) -> (i32, i32) {
    %c0_i32 = arith.constant 0 : i32
    %c0_i32_0 = arith.constant 0 : i32
    return %arg0, %c0_i32 : i32, i32
  }
  func.func @transform_1(%arg0: i32) -> (i32, i32) {
    %c0_i32 = arith.constant 0 : i32
    %c0_i32_0 = arith.constant 0 : i32
    return %arg0, %c0_i32 : i32, i32
  }
  func.func @transform_2(%arg0: i32) -> (i32, i32) {
    %c0_i32 = arith.constant 0 : i32
    %c0_i32_0 = arith.constant 0 : i32
    %c0_i32_1 = arith.constant 0 : i32
    return %c0_i32, %c0_i32_0 : i32, i32
  }
  func.func @transform_3(%arg0: i32) -> (i32, i32) {
    %c0_i32 = arith.constant 0 : i32
    %c0_i32_0 = arith.constant 0 : i32
    %c0_i32_1 = arith.constant 0 : i32
    return %c0_i32, %c0_i32_0 : i32, i32
  }
  func.func @transform_4(%arg0: i32) -> (i32, i32) {
    %c0_i32 = arith.constant 0 : i32
    %c0_i32_0 = arith.constant 0 : i32
    %c0_i32_1 = arith.constant 0 : i32
    return %c0_i32, %c0_i32_0 : i32, i32
  }
  func.func @transform_5(%arg0: i32) -> (i32, i32) {
    %c0_i32 = arith.constant 0 : i32
    %c0_i32_0 = arith.constant 0 : i32
    %c0_i32_1 = arith.constant 0 : i32
    return %c0_i32, %c0_i32_0 : i32, i32
  }
  func.func @transform_6(%arg0: i32) -> (i32, i32) {
    %c0_i32 = arith.constant 0 : i32
    %c0_i32_0 = arith.constant 0 : i32
    %c0_i32_1 = arith.constant 0 : i32
    return %c0_i32, %c0_i32_0 : i32, i32
  }
  func.func @transform_7(%arg0: i32) -> (i32, i32) {
    %c0_i32 = arith.constant 0 : i32
    %c0_i32_0 = arith.constant 0 : i32
    %c0_i32_1 = arith.constant 0 : i32
    return %c0_i32, %c0_i32_0 : i32, i32
  }
  func.func @transform_8(%arg0: i32) -> (i32, i32) {
    %c0_i32 = arith.constant 0 : i32
    %c0_i32_0 = arith.constant 0 : i32
    %c0_i32_1 = arith.constant 0 : i32
    return %c0_i32, %c0_i32_0 : i32, i32
  }
  func.func @transform_9(%arg0: i32) -> (i32, i32) {
    %c0_i32 = arith.constant 0 : i32
    %c0_i32_0 = arith.constant 0 : i32
    %c0_i32_1 = arith.constant 0 : i32
    return %c0_i32, %c0_i32_0 : i32, i32
  }
  func.func @transform_10(%arg0: i32) -> (i32, i32) {
    %c0_i32 = arith.constant 0 : i32
    %c0_i32_0 = arith.constant 0 : i32
    return %arg0, %c0_i32 : i32, i32
  }
}

</mosaic_0001>

<bundles_post_ra>
// kernel: stochastic_mlp_forward.1
= control target key start
LH: loop header
LB: loop body
LE: loop exit
PB: predicated region body
PF: predicated region fallthrough
CT: control target
= control target key end

     0   :  { %15 = vsyncpa [#allocation3], 0  ;;  %s945_s13 = smov 0   ;;  %s1046_s0 = inlined_call_operand.vmem [shape: f32[16,16], index: 0, kind: input, shape index: {}]   ;;  %s1047_s1 = inlined_call_operand.vmem [shape: f32[16,8], index: 1, kind: input, shape index: {}]   ;;  %s1048_s2 = inlined_call_operand.hbm [shape: bf16[16,32], index: 2, kind: input, shape index: {}]   ;;  %s1049_s3 = inlined_call_operand.vmem [shape: f32[1,32], index: 3, kind: input, shape index: {}]   ;;  %s1050_s4 = inlined_call_operand.vmem [shape: bf16[32,32], index: 4, kind: input, shape index: {}]   ;;  %s1051_s5 = inlined_call_operand.vmem [shape: f32[1,32], index: 5, kind: input, shape index: {}]   ;;  %s1052_s6 = inlined_call_operand.vmem [shape: bf16[32,32], index: 6, kind: input, shape index: {}]   ;;  %s1053_s7 = inlined_call_operand.vmem [shape: f32[1,32], index: 7, kind: input, shape index: {}]   ;;  %s1054_s8 = inlined_call_operand.vmem [shape: bf16[32,16], index: 8, kind: input, shape index: {}]   ;;  %s1055_s9 = inlined_call_operand.vmem [shape: f32[1,16], index: 9, kind: input, shape index: {}]   ;;  %s1056_s10 = inlined_call_operand.vmem [shape: f32[16,8], index: 10, kind: output, shape index: {}]  }
   0x1 LB: > { %s951_s14 = sadd.s32 4294967295, %s882_s13   ;;  %p745_p0 = scmp.ge.s32.totalorder %s882_s13, 1  ;;  %s882_s13 = sphi %s945_s13, %s21_s13  }
   0x2   : > { %p272_p1 = scmp.lt.s32.totalorder %s882_s13, 3  ;;  %s884_s15 = smov [#allocation2]  }
   0x3   : > { %s284_s16 = sshll.u32 %s884_s15, 4  ;;  %p1057_p3 = scmp.eq.s32.totalorder %s951_s14, 0  ;;  %s285_s16 = int_to_ptr.vmem [resolvable:$true] %s284_s16 }
   0x4   : > { %p955_p2 = pnand %p745_p0, %p272_p1  ;;  %s844_s21 = scalar_lea.hbm %s1048_s2, 128 }
   0x5   : > { %p845_p6 = scmp.ne.s32.totalorder %s1048_s2, %s844_s21  ;;  %p851_p10 = scmp.lt.u32.totalorder %s844_s21, %s1048_s2 }
   0x6   : > { %s1059_s17 = scalar_select %p955_p2, 1, 0 }
   0x7   : > { %p815_p4 = pneg %p955_p2 }
   0x9   : > { %p964_p5 = pnand %p1057_p3, %p815_p4 }
   0xb   : > { %p846_p7 = pneg %p964_p5 }
   0xd   : > { %p847_p8 = pnand %p846_p7, %p845_p6 }
   0xf   : > { %p848_p9 = pneg %p847_p8 }
  0x11   : > { %p853_p11 = pnand %p851_p10, %p848_p9 }
  0x13   : > { %856 = shalt.err (!%p853_p11)
}
  0x14   : > { %s857_s26 = scalar_lea.vmem %s285_s16, 128  ;;  %p865_p1 = scmp.lt.s32.totalorder %s285_s16, %s285_s16 }
  0x15   : > { %p858_p12 = scmp.ne.s32.totalorder %s285_s16, %s857_s26  ;;  %p866_p4 = scmp.lt.s32.totalorder %s857_s26, %s857_s26 }
  0x17   : > { %p860_p13 = pnand %p858_p12, %p846_p7  ;;  %p867_p3 = por %p866_p4, %p865_p1 }
  0x19   : > { %p861_p0 = pneg %p860_p13 }
  0x1b   : > { %p868_p2 = pnand %p867_p3, %p861_p0 }
  0x1d   : > { %871 = shalt.err (!%p868_p2)
}
  0x1e   : > { %s885_s27 = smov 64   ;;  %s886_s28 = smov 4  }
  0x1f   : > { %818 = dma.hbm_to_vmem [thread:$0]  (!%p964_p5), %s1048_s2, 128, %s285_s16, [#allocation3], %s885_s27, %s885_s27, %s886_s28  }
  0x20   : > { %p1061_p6 = scmp.ne.s32.totalorder %s1059_s17, 0 }
  0x21   : > { %p1062_p8 = scmp.eq.s32.totalorder (!%p1061_p6), %s951_s14, 0 }
  0x22   : > { %335 = sbr.rel (%p1061_p6) target bundleno = 1053 (0x41d), region = 60 }
  0x29   : > { %877 = dma.done.wait (%p1062_p8), [#allocation3], 128   ;;  %p1063_p7 = pmov %p1062_p8 }
  0x2a   : > { %p375_p2 = scmp.lt.s32.totalorder %s951_s14, 1  ;;  %v887_v0 = vmov 0.0   ;;  %vm888_vm0 = vmmov 0   ;;  %v835_v1 = vld [vmem:[#allocation2] sm:$0xff]   ;;  %vm405_vm1 = vcmask 130048   ;;  %v837_v5 = vld [vmem:[%s1050_s4 + $0x8] sm:$0xff]  }
  0x2b   : > { %879 = vsyncadd (%p1063_p7), [#allocation3], 4294967168  ;;  %781 = vmatprep.subr.bf16.mxu0 %v887_v0  ;;  %783 = vmatprep.mubr.msk.bf16.mxu0 %vm888_vm0, %v887_v0  ;;  %v836_v4 = vld [vmem:[%s1050_s4] sm:$0xff]   ;;  %vm474_vm2 = vcmask 261120   ;;  %v839_v15 = vld [vmem:[%s1052_s6 + $0x8] sm:$0xff]   ;;  %vm664_vm3 = vcmask 64512  }
  0x2c   : > { %s1065_s14 = smov (!%p375_p2, %s951_s14), 1  ;;  %787 = vmatprep.subr.bf16.mxu1 %v887_v0  ;;  %791 = vmatprep.mubr.msk.bf16.mxu1 %vm888_vm0, %v887_v0  ;;  %v838_v6 = vld [vmem:[%s1052_s6] sm:$0xff]   ;;  %v841_v25 = vld [vmem:[%s1054_s8 + $0x8] sm:$0xff]  }
  0x2d   : > { %s994_s11 = sshll.u32 %s1065_s14, 3  ;;  %782 = vmatpush3.bf16.msra.mxu0 %v835_v1  ;;  %788 = vmatpush3.bf16.msra.mxu1 %v836_v4  ;;  %v753_v7 = vld [vmem:[%s1049_s3] ss:$0 sm:$0xff]  ;;  %s889_s14 = smov 120  }
  0x2e   : > { %s378_s16 = scalar_lea.vmem %s1046_s0, %s994_s11  ;;  %795 = vmatprep.subr.bf16.mxu0 %v887_v0  ;;  %789 = vmatprep.subr.bf16.mxu1 %v887_v0  ;;  %v840_v16 = vld [vmem:[%s1054_s8] sm:$0xff]   ;;  %s382_s21 = scalar_lea.vmem %s1047_s1, %s994_s11 }
  0x2f   : > { %v388_v2 = vld [vmem:[%s378_s16] sm:$0xff]  ;;  %s386_s24 = scalar_lea.vmem %s1056_s10, %s994_s11 }
  0x30   : > { %v389_v3 = vpack.c.bf16 %v388_v2, %v388_v2  ;;  %v756_v17 = vld [vmem:[%s1051_s5] ss:$0 sm:$0xff] }
  0x31   : > { %790 = vmatpush3.bf16.msra.mxu1 %v837_v5  ;;  %v760_v26 = vld [vmem:[%s1053_s7] ss:$0 sm:$0xff] }
  0x32   : > { %784 = vmatmul.mubr.msk.bf16.vlgmr.msra.gmra.mrb[0].mxu0 %vm405_vm1, %v389_v3  ;;  %803 = vmatprep.subr.bf16.mxu1 %v887_v0  ;;  %v764_v34 = vld [vmem:[%s1055_s9] ss:$0 sm:$0xff] }
  0x33   : > { %799 = vmatprep.mubr.msk.bf16.mxu0 %vm888_vm0, %v887_v0  ;;  %796 = vmatpush3.bf16.msra.mxu0 %v838_v6  ;;  %v654_v43 = vld [vmem:[%s382_s21] sm:$0xff] }
  0x34   : > { %797 = vmatprep.subr.bf16.mxu0 %v887_v0 }
  0x37   : > { %798 = vmatpush3.bf16.msra.mxu0 %v839_v15 }
 0x105   : > { %v443_v8 = vpop.f32.mrb[0].mxu0 }
 0x106   : > { %v444_v9 = vadd.f32 %v753_v7, %v443_v8  ;;  %v785_v10 = vpop.f32.mrb[1].mxu0 }
 0x107   : > { %v446_v11 = vpop.f32.mrb[2].mxu0 }
 0x108   : > { %v449_v12 = vmax.f32 %v444_v9, 0.0  ;;  %v786_v13 = vpop.f32.mrb[3].mxu0 }
 0x10a   : > { %v450_v14 = vpack.c.bf16 %v449_v12, %v449_v12 }
 0x10c   : > { %792 = vmatmul.mubr.msk.bf16.vlgmr.msra.gmra.mrb[0].mxu1 %vm474_vm2, %v450_v14 }
 0x10d   : > { %807 = vmatprep.mubr.msk.bf16.mxu1 %vm888_vm0, %v887_v0  ;;  %804 = vmatpush3.bf16.msra.mxu1 %v840_v16 }
 0x10e   : > { %805 = vmatprep.subr.bf16.mxu1 %v887_v0 }
 0x111   : > { %806 = vmatpush3.bf16.msra.mxu1 %v841_v25 }
 0x1df   : > { %v512_v18 = vpop.f32.mrb[0].mxu1 }
 0x1e0   : > { %v513_v19 = vadd.f32 %v756_v17, %v512_v18  ;;  %v793_v20 = vpop.f32.mrb[1].mxu1 }
 0x1e1   : > { %v515_v21 = vpop.f32.mrb[2].mxu1 }
 0x1e2   : > { %v518_v22 = vmax.f32 %v513_v19, 0.0  ;;  %v794_v23 = vpop.f32.mrb[3].mxu1 }
 0x1e4   : > { %v519_v24 = vpack.c.bf16 %v518_v22, %v518_v22 }
 0x1e6   : > { %800 = vmatmul.mubr.msk.bf16.vlgmr.msra.gmra.mrb[4].mxu0 %vm474_vm2, %v519_v24 }
 0x2b9   : > { %v580_v27 = vpop.f32.mrb[4].mxu0 }
 0x2ba   : > { %v581_v28 = vadd.f32 %v760_v26, %v580_v27  ;;  %v801_v29 = vpop.f32.mrb[5].mxu0 }
 0x2bb   : > { %v583_v30 = vpop.f32.mrb[6].mxu0 }
 0x2bc   : > { %v586_v31 = vmax.f32 %v581_v28, 0.0  ;;  %v802_v32 = vpop.f32.mrb[7].mxu0 }
 0x2be   : > { %v587_v33 = vpack.c.bf16 %v586_v31, %v586_v31 }
 0x2c0   : > { %808 = vmatmul.mubr.msk.bf16.vlgmr.msra.gmra.mrb[4].mxu1 %vm474_vm2, %v587_v33 }
 0x393   : > { %v648_v35 = vpop.f32.mrb[4].mxu1 }
 0x394   : > { %v649_v36 = vadd.f32 %v764_v34, %v648_v35  ;;  %v809_v37 = vpop.f32.mrb[5].mxu1 }
 0x395   : > { %v651_v38 = vpop.f32.mrb[6].mxu1 }
 0x396   : > { %v655_v39 = vmul.f32 0.5, %v649_v36  ;;  %v810_v40 = vpop.f32.mrb[7].mxu1 }
 0x398   : > { %v656_v41 = vmul.f32 1.442695, %v655_v39 }
 0x39a   : > { %842 = vpow2.f32 %v656_v41 }
 0x3a4   : > { %v843_v42 = vpop.eup %842 }
 0x3a5   : > { %659 = vrot.lane.b32.xlu0 %v843_v42, %s889_s14 }
 0x417   : > { %v660_v44 = vpop.permute.xlu0 %659 }
 0x418   : > { %v662_v45 = vmul.f32 %v660_v44, %v654_v43 }
 0x41a   : > { %v663_v46 = vadd.f32 %v662_v45, %v649_v36 }
 0x41c   : > { %665 = vst.msk [vmem:[%s386_s24] sm:$0xff] %vm664_vm3, %v663_v46 }
 0x41d PF: > { %s21_s13 = sadd.s32 1, %s882_s13  }
 0x41e   : > { %p18_p3 = scmp.ge.s32.totalorder %s21_s13, 4  }
 0x420   :  { %20 = sbr.rel (!%p18_p3) target bundleno = 1 (0x1), region = 98 }
 0x427   :  { %685 = vsyncpa [#allocation3], 1 }
 0x428   :  { %687 = vsyncpa [#allocation3 + $0x1], 1 }

</bundles_post_ra>
